<compile_context>
chip_gen: v5e
topology: v5e:2x2
jax: 0.10.0
libtpu: 0.0.40
codegen_flags: <defaults>
</compile_context>

<pallas_src>
import functools

import jax
import jax.numpy as jnp
from jax import lax
from jax.experimental import pallas as pl
from jax.experimental.pallas import tpu as pltpu

LN_EPS = 1e-5


def _layernorm(x, gamma, beta, inv_d):
    # Single-pass LayerNorm: biased variance over last dim (matches PyTorch).
    s1 = jnp.sum(x, axis=-1, keepdims=True)
    s2 = jnp.sum(x * x, axis=-1, keepdims=True)
    mu = s1 * inv_d
    var = s2 * inv_d - mu * mu
    return (x - mu) * lax.rsqrt(var + LN_EPS) * gamma + beta


def encoder_layer_kernel(
    x_ref, wqkv_ref, wo_ref, w1_ref, w2_ref,
    g1_ref, b1_ref, g2_ref, b2_ref,
    out_ref, attn_ref,
    *, n_heads: int,
):
    x = x_ref[0].astype(jnp.float32)                       # [L, D]
    L, D = x.shape
    dh = D // n_heads
    scale = jnp.float32(1.0 / (dh ** 0.5))
    inv_d = jnp.float32(1.0 / D)

    x_bf = x.astype(jnp.bfloat16)

    # ---- fused QKV projection: one wide bf16 MXU pass, f32 accumulation ----
    qkv = jnp.dot(x_bf, wqkv_ref[...], preferred_element_type=jnp.float32)   # [L, 3D]
    q_bf = (qkv[:, :D] * scale).astype(jnp.bfloat16)       # fold softmax scale into q
    k_bf = qkv[:, D:2 * D].astype(jnp.bfloat16)
    v_bf = qkv[:, 2 * D:].astype(jnp.bfloat16)

    # ---- multi-head attention; per-head ctx folded into output projection ----
    new_x = jnp.zeros((L, D), jnp.float32)
    for h in range(n_heads):
        qh = q_bf[:, h * dh:(h + 1) * dh]
        kh = k_bf[:, h * dh:(h + 1) * dh]
        vh = v_bf[:, h * dh:(h + 1) * dh]

        # scores (q already carries the 1/sqrt(dh) scale), f32 softmax math
        s = jnp.einsum('qd,kd->qk', qh, kh,
                       preferred_element_type=jnp.float32)               # [L, L]
        m = jnp.max(s, axis=-1, keepdims=True)
        p = jnp.exp(s - m)
        denom = jnp.sum(p, axis=-1, keepdims=True)
        p = p * pl.reciprocal(denom, approx=True)                        # EUP vrcp
        attn_ref[0, h] = p.astype(attn_ref.dtype)

        ctx_h = jnp.dot(p.astype(jnp.bfloat16), vh,
                        preferred_element_type=jnp.float32)              # [L, dh]
        # ctx @ Wo == sum_h ctx_h @ Wo[h*dh:(h+1)*dh, :]  -> no concat needed
        new_x = new_x + jnp.dot(ctx_h.astype(jnp.bfloat16),
                                wo_ref[pl.ds(h * dh, dh), :],
                                preferred_element_type=jnp.float32)      # [L, D]

    # ---- residual + norm1 (dropout = identity in eval mode) ----
    xn = _layernorm(x + new_x, g1_ref[...], b1_ref[...], inv_d)

    # ---- position-wise FFN (conv1d k=1 == matmul) + relu + residual + norm2 ----
    h1 = jnp.maximum(
        jnp.dot(xn.astype(jnp.bfloat16), w1_ref[...],
                preferred_element_type=jnp.float32), 0.0)                # [L, d_ff]
    y = jnp.dot(h1.astype(jnp.bfloat16), w2_ref[...],
                preferred_element_type=jnp.float32)                      # [L, D]
    out = _layernorm(xn + y, g2_ref[...], b2_ref[...], inv_d)

    out_ref[0] = out.astype(out_ref.dtype)


def _vmem_limit_bytes(B, L, D, d_ff, H):
    """Rough working-set estimate (double-buffered operands + temporaries)."""
    bf, f4 = 2, 4
    weights = 2 * bf * (3 * D * D + D * D + D * d_ff + d_ff * D)     # bf16, dbl-buffered
    ln_params = 2 * f4 * 4 * D
    io = 2 * f4 * 2 * L * D                                          # x + out blocks
    attn = 2 * f4 * H * L * L                                        # attn output block
    scratch = f4 * (3 * L * D + 2 * L * L + L * d_ff + 6 * L * D)    # in-kernel temps
    est = weights + ln_params + io + attn + scratch
    return int(min(100 * 1024 * 1024, max(32 * 1024 * 1024, 3 * est // 2)))


def encoder_layer(x, params, *, n_heads):
    """x: [B, L, D] float32.  Returns (out [B, L, D], attn [B, H, L, L])."""
    B, L, D = x.shape
    d_ff = params["w1"].shape[1]
    H = n_heads
    assert D % H == 0

    # Fuse Q/K/V into one wide weight and ship all matmul weights as bf16.
    wqkv = jnp.concatenate(
        [params["wq"], params["wk"], params["wv"]], axis=1).astype(jnp.bfloat16)
    wo = params["wo"].astype(jnp.bfloat16)
    w1 = params["w1"].astype(jnp.bfloat16)
    w2 = params["w2"].astype(jnp.bfloat16)
    g1 = params["g1"].astype(jnp.float32)
    b1 = params["b1"].astype(jnp.float32)
    g2 = params["g2"].astype(jnp.float32)
    b2 = params["b2"].astype(jnp.float32)

    kernel = functools.partial(encoder_layer_kernel, n_heads=H)
    full2d = lambda b: (0, 0)

    grid_spec = pltpu.PrefetchScalarGridSpec(
        num_scalar_prefetch=0,
        grid=(B,),
        in_specs=[
            pl.BlockSpec((1, L, D), lambda b: (b, 0, 0)),   # x
            pl.BlockSpec((D, 3 * D), full2d),               # fused Wqkv (bf16)
            pl.BlockSpec((D, D), full2d),                   # Wo   (bf16)
            pl.BlockSpec((D, d_ff), full2d),                # W1   (bf16)
            pl.BlockSpec((d_ff, D), full2d),                # W2   (bf16)
            pl.BlockSpec((1, D), full2d),                   # norm1 gamma
            pl.BlockSpec((1, D), full2d),                   # norm1 beta
            pl.BlockSpec((1, D), full2d),                   # norm2 gamma
            pl.BlockSpec((1, D), full2d),                   # norm2 beta
        ],
        out_specs=[
            pl.BlockSpec((1, L, D), lambda b: (b, 0, 0)),          # output
            pl.BlockSpec((1, H, L, L), lambda b: (b, 0, 0, 0)),    # attention weights
        ],
    )

    out, attn = pl.pallas_call(
        kernel,
        out_shape=(
            jax.ShapeDtypeStruct((B, L, D), x.dtype),
            jax.ShapeDtypeStruct((B, H, L, L), jnp.float32),
        ),
        grid_spec=grid_spec,
        compiler_params=pltpu.CompilerParams(
            dimension_semantics=("parallel",),
            vmem_limit_bytes=_vmem_limit_bytes(B, L, D, d_ff, H),
        ),
    )(x, wqkv, wo, w1, w2, g1, b1, g2, b2)
    return out, attn


def init_params(key, d_model, d_ff, dtype=jnp.float32):
    ks = jax.random.split(key, 6)
    s = 0.05
    return {
        "wq": s * jax.random.normal(ks[0], (d_model, d_model), dtype),
        "wk": s * jax.random.normal(ks[1], (d_model, d_model), dtype),
        "wv": s * jax.random.normal(ks[2], (d_model, d_model), dtype),
        "wo": s * jax.random.normal(ks[3], (d_model, d_model), dtype),
        # conv1: PyTorch weight [d_ff, d_model, 1] -> stored transposed as [d_model, d_ff]
        "w1": s * jax.random.normal(ks[4], (d_model, d_ff), dtype),
        # conv2: PyTorch weight [d_model, d_ff, 1] -> stored transposed as [d_ff, d_model]
        "w2": s * jax.random.normal(ks[5], (d_ff, d_model), dtype),
        "g1": jnp.ones((1, d_model), dtype),
        "b1": jnp.zeros((1, d_model), dtype),
        "g2": jnp.ones((1, d_model), dtype),
        "b2": jnp.zeros((1, d_model), dtype),
    }


def encoder_layer_ref(x, params, *, n_heads):
    """Pure-JAX f32 reference mirroring the PyTorch module (eval mode)."""
    B, L, D = x.shape
    H = n_heads
    dh = D // H
    q = (x @ params["wq"]).reshape(B, L, H, dh).transpose(0, 2, 1, 3)
    k = (x @ params["wk"]).reshape(B, L, H, dh).transpose(0, 2, 1, 3)
    v = (x @ params["wv"]).reshape(B, L, H, dh).transpose(0, 2, 1, 3)
    s = jnp.einsum('bhqd,bhkd->bhqk', q, k) / jnp.sqrt(jnp.float32(dh))
    attn = jax.nn.softmax(s, axis=-1)
    ctx = jnp.einsum('bhqk,bhkd->bhqd', attn, v)
    ctx = ctx.transpose(0, 2, 1, 3).reshape(B, L, D)
    new_x = ctx @ params["wo"]

    def ln(z, g, b):
        mu = z.mean(-1, keepdims=True)
        var = ((z - mu) ** 2).mean(-1, keepdims=True)
        return (z - mu) / jnp.sqrt(var + LN_EPS) * g + b

    xn = ln(x + new_x, params["g1"], params["b1"])
    h1 = jax.nn.relu(xn @ params["w1"])
    y = h1 @ params["w2"]
    return ln(xn + y, params["g2"], params["b2"]), attn


if __name__ == "__main__":
    B, L, D, H = 2, 8, 32, 4          # batch, seq, d_model, n_heads
    d_ff = 4 * D                      # default d_ff = 4 * d_model

    key = jax.random.PRNGKey(0)
    kx, kp = jax.random.split(key)
    x = jax.random.normal(kx, (B, L, D), jnp.float32)
    params = init_params(kp, D, d_ff)

    out, attn = encoder_layer(x, params, n_heads=H)
    out = jax.block_until_ready(out)
    attn = jax.block_until_ready(attn)

    assert out.shape == (B, L, D)
    assert attn.shape == (B, H, L, L)
    assert bool(jnp.all(jnp.isfinite(out)))
    assert bool(jnp.all(jnp.isfinite(attn)))

    # Loose check vs the pure-JAX f32 reference (kernel uses bf16 MXU operands
    # and an approx reciprocal in the softmax).
    out_r, attn_r = encoder_layer_ref(x, params, n_heads=H)
    assert jnp.allclose(out, out_r, atol=7e-2, rtol=7e-2), \
        float(jnp.max(jnp.abs(out - out_r)))
    assert jnp.allclose(attn, attn_r, atol=2e-2, rtol=2e-2), \
        float(jnp.max(jnp.abs(attn - attn_r)))

    print("KERNEL_OK")
</pallas_src>

<mosaic_0001>
module attributes {stable_mosaic.version = 11 : i64} {
  func.func @encoder_layer_kernel(%arg0: i32, %arg1: memref<1x8x32xf32, #tpu.memory_space<vmem>>, %arg2: memref<32x96xbf16, #tpu.memory_space<vmem>>, %arg3: memref<32x32xbf16, #tpu.memory_space<vmem>>, %arg4: memref<32x128xbf16, #tpu.memory_space<vmem>>, %arg5: memref<128x32xbf16, #tpu.memory_space<vmem>>, %arg6: memref<1x32xf32, #tpu.memory_space<vmem>>, %arg7: memref<1x32xf32, #tpu.memory_space<vmem>>, %arg8: memref<1x32xf32, #tpu.memory_space<vmem>>, %arg9: memref<1x32xf32, #tpu.memory_space<vmem>>, %arg10: memref<1x8x32xf32, #tpu.memory_space<vmem>>, %arg11: memref<1x4x8x8xf32, #tpu.memory_space<vmem>>) attributes {dimension_semantics = [#tpu.dimension_semantics<parallel>], iteration_bounds = array<i64: 2>, scalar_prefetch = 0 : i64, scratch_operands = 0 : i64, tpu.core_type = #tpu.core_type<tc>, window_params = [{transform_indices = @transform_0, window_bounds = array<i64: 1, 8, 32>}, {pipeline_mode = #tpu.pipeline_mode<synchronous>, transform_indices = @transform_1, window_bounds = array<i64: 32, 96>}, {pipeline_mode = #tpu.pipeline_mode<synchronous>, transform_indices = @transform_2, window_bounds = array<i64: 32, 32>}, {pipeline_mode = #tpu.pipeline_mode<synchronous>, transform_indices = @transform_3, window_bounds = array<i64: 32, 128>}, {pipeline_mode = #tpu.pipeline_mode<synchronous>, transform_indices = @transform_4, window_bounds = array<i64: 128, 32>}, {pipeline_mode = #tpu.pipeline_mode<synchronous>, transform_indices = @transform_5, window_bounds = array<i64: 1, 32>}, {pipeline_mode = #tpu.pipeline_mode<synchronous>, transform_indices = @transform_6, window_bounds = array<i64: 1, 32>}, {pipeline_mode = #tpu.pipeline_mode<synchronous>, transform_indices = @transform_7, window_bounds = array<i64: 1, 32>}, {pipeline_mode = #tpu.pipeline_mode<synchronous>, transform_indices = @transform_8, window_bounds = array<i64: 1, 32>}, {transform_indices = @transform_9, window_bounds = array<i64: 1, 8, 32>}, {transform_indices = @transform_10, window_bounds = array<i64: 1, 4, 8, 8>}]} {
    %c0 = arith.constant 0 : index
    %c0_0 = arith.constant 0 : index
    %c0_1 = arith.constant 0 : index
    %0 = vector.load %arg1[%c0, %c0_0, %c0_1] : memref<1x8x32xf32, #tpu.memory_space<vmem>>, vector<1x8x32xf32>
    %1 = vector.shape_cast %0 : vector<1x8x32xf32> to vector<8x32xf32>
    %2 = arith.truncf %1 : vector<8x32xf32> to vector<8x32xbf16>
    %c0_2 = arith.constant 0 : index
    %c0_3 = arith.constant 0 : index
    %3 = vector.load %arg2[%c0_2, %c0_3] : memref<32x96xbf16, #tpu.memory_space<vmem>>, vector<32x96xbf16>
    %cst = arith.constant dense<0.000000e+00> : vector<8x96xf32>
    %4 = tpu.matmul %2, %3, %cst {dimension_numbers = #tpu.dot_dimension_numbers<[1], [0], [0], [1], [0, 0, 1, 1], [], []>} : vector<8x32xbf16>, vector<32x96xbf16>, vector<8x96xf32> -> vector<8x96xf32>
    %5 = vector.extract_strided_slice %4 {offsets = [0, 0], sizes = [8, 32], strides = [1, 1]} : vector<8x96xf32> to vector<8x32xf32>
    %cst_4 = arith.constant 0.353553385 : f32
    %6 = vector.broadcast %cst_4 : f32 to vector<8x32xf32>
    %7 = arith.mulf %5, %6 : vector<8x32xf32>
    %8 = arith.truncf %7 : vector<8x32xf32> to vector<8x32xbf16>
    %9 = vector.extract_strided_slice %4 {offsets = [0, 32], sizes = [8, 32], strides = [1, 1]} : vector<8x96xf32> to vector<8x32xf32>
    %10 = arith.truncf %9 : vector<8x32xf32> to vector<8x32xbf16>
    %11 = vector.extract_strided_slice %4 {offsets = [0, 64], sizes = [8, 32], strides = [1, 1]} : vector<8x96xf32> to vector<8x32xf32>
    %12 = arith.truncf %11 : vector<8x32xf32> to vector<8x32xbf16>
    %cst_5 = arith.constant 0.000000e+00 : f32
    %13 = vector.broadcast %cst_5 : f32 to vector<8x32xf32>
    %14 = vector.extract_strided_slice %8 {offsets = [0, 0], sizes = [8, 8], strides = [1, 1]} : vector<8x32xbf16> to vector<8x8xbf16>
    %15 = vector.extract_strided_slice %10 {offsets = [0, 0], sizes = [8, 8], strides = [1, 1]} : vector<8x32xbf16> to vector<8x8xbf16>
    %16 = vector.extract_strided_slice %12 {offsets = [0, 0], sizes = [8, 8], strides = [1, 1]} : vector<8x32xbf16> to vector<8x8xbf16>
    "tpu.trace_start"() <{level = 10 : i32, message = "qd,kd->qk"}> : () -> ()
    %cst_6 = arith.constant dense<0.000000e+00> : vector<8x8xf32>
    %17 = tpu.matmul %14, %15, %cst_6 {dimension_numbers = #tpu.dot_dimension_numbers<[1], [1], [0], [0], [0, 0, 1, 0], [], []>} : vector<8x8xbf16>, vector<8x8xbf16>, vector<8x8xf32> -> vector<8x8xf32>
    "tpu.trace_stop"() : () -> ()
    %cst_7 = arith.constant dense<0xFF800000> : vector<8xf32>
    %18 = vector.multi_reduction <maximumf>, %17, %cst_7 [1] : vector<8x8xf32> to vector<8xf32>
    %19 = vector.shape_cast %18 : vector<8xf32> to vector<8x1xf32>
    %20 = vector.broadcast %19 : vector<8x1xf32> to vector<8x8xf32>
    %21 = arith.subf %17, %20 : vector<8x8xf32>
    %22 = math.exp %21 : vector<8x8xf32>
    %cst_8 = arith.constant dense<0.000000e+00> : vector<8xf32>
    %23 = vector.multi_reduction <add>, %22, %cst_8 [1] : vector<8x8xf32> to vector<8xf32>
    %24 = vector.shape_cast %23 : vector<8xf32> to vector<8x1xf32>
    %25 = tpu.reciprocal %24 {approx = true} : vector<8x1xf32> -> vector<8x1xf32>
    %26 = vector.broadcast %25 : vector<8x1xf32> to vector<8x8xf32>
    %27 = arith.mulf %22, %26 : vector<8x8xf32>
    %c0_9 = arith.constant 0 : index
    %c0_10 = arith.constant 0 : index
    %c0_11 = arith.constant 0 : index
    %c0_12 = arith.constant 0 : index
    %28 = vector.load %arg11[%c0_9, %c0_10, %c0_11, %c0_12] : memref<1x4x8x8xf32, #tpu.memory_space<vmem>>, vector<1x1x8x8xf32>
    %29 = vector.shape_cast %28 : vector<1x1x8x8xf32> to vector<8x8xf32>
    %30 = vector.shape_cast %27 : vector<8x8xf32> to vector<1x1x8x8xf32>
    tpu.vector_store %arg11[%c0_9, %c0_10, %c0_11, %c0_12], %30 {strides = array<i32>} : memref<1x4x8x8xf32, #tpu.memory_space<vmem>>, vector<1x1x8x8xf32>,
    %31 = arith.truncf %27 : vector<8x8xf32> to vector<8x8xbf16>
    %cst_13 = arith.constant dense<0.000000e+00> : vector<8x8xf32>
    %32 = tpu.matmul %31, %16, %cst_13 {dimension_numbers = #tpu.dot_dimension_numbers<[1], [0], [0], [1], [0, 0, 1, 1], [], []>} : vector<8x8xbf16>, vector<8x8xbf16>, vector<8x8xf32> -> vector<8x8xf32>
    %33 = arith.truncf %32 : vector<8x8xf32> to vector<8x8xbf16>
    %c0_14 = arith.constant 0 : index
    %c0_15 = arith.constant 0 : index
    %34 = vector.load %arg3[%c0_14, %c0_15] : memref<32x32xbf16, #tpu.memory_space<vmem>>, vector<8x32xbf16>
    %cst_16 = arith.constant dense<0.000000e+00> : vector<8x32xf32>
    %35 = tpu.matmul %33, %34, %cst_16 {dimension_numbers = #tpu.dot_dimension_numbers<[1], [0], [0], [1], [0, 0, 1, 1], [], []>} : vector<8x8xbf16>, vector<8x32xbf16>, vector<8x32xf32> -> vector<8x32xf32>
    %36 = arith.addf %13, %35 : vector<8x32xf32>
    %37 = vector.extract_strided_slice %8 {offsets = [0, 8], sizes = [8, 8], strides = [1, 1]} : vector<8x32xbf16> to vector<8x8xbf16>
    %38 = vector.extract_strided_slice %10 {offsets = [0, 8], sizes = [8, 8], strides = [1, 1]} : vector<8x32xbf16> to vector<8x8xbf16>
    %39 = vector.extract_strided_slice %12 {offsets = [0, 8], sizes = [8, 8], strides = [1, 1]} : vector<8x32xbf16> to vector<8x8xbf16>
    "tpu.trace_start"() <{level = 10 : i32, message = "qd,kd->qk"}> : () -> ()
    %cst_17 = arith.constant dense<0.000000e+00> : vector<8x8xf32>
    %40 = tpu.matmul %37, %38, %cst_17 {dimension_numbers = #tpu.dot_dimension_numbers<[1], [1], [0], [0], [0, 0, 1, 0], [], []>} : vector<8x8xbf16>, vector<8x8xbf16>, vector<8x8xf32> -> vector<8x8xf32>
    "tpu.trace_stop"() : () -> ()
    %cst_18 = arith.constant dense<0xFF800000> : vector<8xf32>
    %41 = vector.multi_reduction <maximumf>, %40, %cst_18 [1] : vector<8x8xf32> to vector<8xf32>
    %42 = vector.shape_cast %41 : vector<8xf32> to vector<8x1xf32>
    %43 = vector.broadcast %42 : vector<8x1xf32> to vector<8x8xf32>
    %44 = arith.subf %40, %43 : vector<8x8xf32>
    %45 = math.exp %44 : vector<8x8xf32>
    %cst_19 = arith.constant dense<0.000000e+00> : vector<8xf32>
    %46 = vector.multi_reduction <add>, %45, %cst_19 [1] : vector<8x8xf32> to vector<8xf32>
    %47 = vector.shape_cast %46 : vector<8xf32> to vector<8x1xf32>
    %48 = tpu.reciprocal %47 {approx = true} : vector<8x1xf32> -> vector<8x1xf32>
    %49 = vector.broadcast %48 : vector<8x1xf32> to vector<8x8xf32>
    %50 = arith.mulf %45, %49 : vector<8x8xf32>
    %c0_20 = arith.constant 0 : index
    %c1 = arith.constant 1 : index
    %c0_21 = arith.constant 0 : index
    %c0_22 = arith.constant 0 : index
    %51 = vector.load %arg11[%c0_20, %c1, %c0_21, %c0_22] : memref<1x4x8x8xf32, #tpu.memory_space<vmem>>, vector<1x1x8x8xf32>
    %52 = vector.shape_cast %51 : vector<1x1x8x8xf32> to vector<8x8xf32>
    %53 = vector.shape_cast %50 : vector<8x8xf32> to vector<1x1x8x8xf32>
    tpu.vector_store %arg11[%c0_20, %c1, %c0_21, %c0_22], %53 {strides = array<i32>} : memref<1x4x8x8xf32, #tpu.memory_space<vmem>>, vector<1x1x8x8xf32>,
    %54 = arith.truncf %50 : vector<8x8xf32> to vector<8x8xbf16>
    %cst_23 = arith.constant dense<0.000000e+00> : vector<8x8xf32>
    %55 = tpu.matmul %54, %39, %cst_23 {dimension_numbers = #tpu.dot_dimension_numbers<[1], [0], [0], [1], [0, 0, 1, 1], [], []>} : vector<8x8xbf16>, vector<8x8xbf16>, vector<8x8xf32> -> vector<8x8xf32>
    %56 = arith.truncf %55 : vector<8x8xf32> to vector<8x8xbf16>
    %c8 = arith.constant 8 : index
    %c0_24 = arith.constant 0 : index
    %57 = vector.load %arg3[%c8, %c0_24] : memref<32x32xbf16, #tpu.memory_space<vmem>>, vector<8x32xbf16>
    %cst_25 = arith.constant dense<0.000000e+00> : vector<8x32xf32>
    %58 = tpu.matmul %56, %57, %cst_25 {dimension_numbers = #tpu.dot_dimension_numbers<[1], [0], [0], [1], [0, 0, 1, 1], [], []>} : vector<8x8xbf16>, vector<8x32xbf16>, vector<8x32xf32> -> vector<8x32xf32>
    %59 = arith.addf %36, %58 : vector<8x32xf32>
    %60 = vector.extract_strided_slice %8 {offsets = [0, 16], sizes = [8, 8], strides = [1, 1]} : vector<8x32xbf16> to vector<8x8xbf16>
    %61 = vector.extract_strided_slice %10 {offsets = [0, 16], sizes = [8, 8], strides = [1, 1]} : vector<8x32xbf16> to vector<8x8xbf16>
    %62 = vector.extract_strided_slice %12 {offsets = [0, 16], sizes = [8, 8], strides = [1, 1]} : vector<8x32xbf16> to vector<8x8xbf16>
    "tpu.trace_start"() <{level = 10 : i32, message = "qd,kd->qk"}> : () -> ()
    %cst_26 = arith.constant dense<0.000000e+00> : vector<8x8xf32>
    %63 = tpu.matmul %60, %61, %cst_26 {dimension_numbers = #tpu.dot_dimension_numbers<[1], [1], [0], [0], [0, 0, 1, 0], [], []>} : vector<8x8xbf16>, vector<8x8xbf16>, vector<8x8xf32> -> vector<8x8xf32>
    "tpu.trace_stop"() : () -> ()
    %cst_27 = arith.constant dense<0xFF800000> : vector<8xf32>
    %64 = vector.multi_reduction <maximumf>, %63, %cst_27 [1] : vector<8x8xf32> to vector<8xf32>
    %65 = vector.shape_cast %64 : vector<8xf32> to vector<8x1xf32>
    %66 = vector.broadcast %65 : vector<8x1xf32> to vector<8x8xf32>
    %67 = arith.subf %63, %66 : vector<8x8xf32>
    %68 = math.exp %67 : vector<8x8xf32>
    %cst_28 = arith.constant dense<0.000000e+00> : vector<8xf32>
    %69 = vector.multi_reduction <add>, %68, %cst_28 [1] : vector<8x8xf32> to vector<8xf32>
    %70 = vector.shape_cast %69 : vector<8xf32> to vector<8x1xf32>
    %71 = tpu.reciprocal %70 {approx = true} : vector<8x1xf32> -> vector<8x1xf32>
    %72 = vector.broadcast %71 : vector<8x1xf32> to vector<8x8xf32>
    %73 = arith.mulf %68, %72 : vector<8x8xf32>
    %c0_29 = arith.constant 0 : index
    %c2 = arith.constant 2 : index
    %c0_30 = arith.constant 0 : index
    %c0_31 = arith.constant 0 : index
    %74 = vector.load %arg11[%c0_29, %c2, %c0_30, %c0_31] : memref<1x4x8x8xf32, #tpu.memory_space<vmem>>, vector<1x1x8x8xf32>
    %75 = vector.shape_cast %74 : vector<1x1x8x8xf32> to vector<8x8xf32>
    %76 = vector.shape_cast %73 : vector<8x8xf32> to vector<1x1x8x8xf32>
    tpu.vector_store %arg11[%c0_29, %c2, %c0_30, %c0_31], %76 {strides = array<i32>} : memref<1x4x8x8xf32, #tpu.memory_space<vmem>>, vector<1x1x8x8xf32>,
    %77 = arith.truncf %73 : vector<8x8xf32> to vector<8x8xbf16>
    %cst_32 = arith.constant dense<0.000000e+00> : vector<8x8xf32>
    %78 = tpu.matmul %77, %62, %cst_32 {dimension_numbers = #tpu.dot_dimension_numbers<[1], [0], [0], [1], [0, 0, 1, 1], [], []>} : vector<8x8xbf16>, vector<8x8xbf16>, vector<8x8xf32> -> vector<8x8xf32>
    %79 = arith.truncf %78 : vector<8x8xf32> to vector<8x8xbf16>
    %c16 = arith.constant 16 : index
    %c0_33 = arith.constant 0 : index
    %80 = vector.load %arg3[%c16, %c0_33] : memref<32x32xbf16, #tpu.memory_space<vmem>>, vector<8x32xbf16>
    %cst_34 = arith.constant dense<0.000000e+00> : vector<8x32xf32>
    %81 = tpu.matmul %79, %80, %cst_34 {dimension_numbers = #tpu.dot_dimension_numbers<[1], [0], [0], [1], [0, 0, 1, 1], [], []>} : vector<8x8xbf16>, vector<8x32xbf16>, vector<8x32xf32> -> vector<8x32xf32>
    %82 = arith.addf %59, %81 : vector<8x32xf32>
    %83 = vector.extract_strided_slice %8 {offsets = [0, 24], sizes = [8, 8], strides = [1, 1]} : vector<8x32xbf16> to vector<8x8xbf16>
    %84 = vector.extract_strided_slice %10 {offsets = [0, 24], sizes = [8, 8], strides = [1, 1]} : vector<8x32xbf16> to vector<8x8xbf16>
    %85 = vector.extract_strided_slice %12 {offsets = [0, 24], sizes = [8, 8], strides = [1, 1]} : vector<8x32xbf16> to vector<8x8xbf16>
    "tpu.trace_start"() <{level = 10 : i32, message = "qd,kd->qk"}> : () -> ()
    %cst_35 = arith.constant dense<0.000000e+00> : vector<8x8xf32>
    %86 = tpu.matmul %83, %84, %cst_35 {dimension_numbers = #tpu.dot_dimension_numbers<[1], [1], [0], [0], [0, 0, 1, 0], [], []>} : vector<8x8xbf16>, vector<8x8xbf16>, vector<8x8xf32> -> vector<8x8xf32>
    "tpu.trace_stop"() : () -> ()
    %cst_36 = arith.constant dense<0xFF800000> : vector<8xf32>
    %87 = vector.multi_reduction <maximumf>, %86, %cst_36 [1] : vector<8x8xf32> to vector<8xf32>
    %88 = vector.shape_cast %87 : vector<8xf32> to vector<8x1xf32>
    %89 = vector.broadcast %88 : vector<8x1xf32> to vector<8x8xf32>
    %90 = arith.subf %86, %89 : vector<8x8xf32>
    %91 = math.exp %90 : vector<8x8xf32>
    %cst_37 = arith.constant dense<0.000000e+00> : vector<8xf32>
    %92 = vector.multi_reduction <add>, %91, %cst_37 [1] : vector<8x8xf32> to vector<8xf32>
    %93 = vector.shape_cast %92 : vector<8xf32> to vector<8x1xf32>
    %94 = tpu.reciprocal %93 {approx = true} : vector<8x1xf32> -> vector<8x1xf32>
    %95 = vector.broadcast %94 : vector<8x1xf32> to vector<8x8xf32>
    %96 = arith.mulf %91, %95 : vector<8x8xf32>
    %c0_38 = arith.constant 0 : index
    %c3 = arith.constant 3 : index
    %c0_39 = arith.constant 0 : index
    %c0_40 = arith.constant 0 : index
    %97 = vector.load %arg11[%c0_38, %c3, %c0_39, %c0_40] : memref<1x4x8x8xf32, #tpu.memory_space<vmem>>, vector<1x1x8x8xf32>
    %98 = vector.shape_cast %97 : vector<1x1x8x8xf32> to vector<8x8xf32>
    %99 = vector.shape_cast %96 : vector<8x8xf32> to vector<1x1x8x8xf32>
    tpu.vector_store %arg11[%c0_38, %c3, %c0_39, %c0_40], %99 {strides = array<i32>} : memref<1x4x8x8xf32, #tpu.memory_space<vmem>>, vector<1x1x8x8xf32>,
    %100 = arith.truncf %96 : vector<8x8xf32> to vector<8x8xbf16>
    %cst_41 = arith.constant dense<0.000000e+00> : vector<8x8xf32>
    %101 = tpu.matmul %100, %85, %cst_41 {dimension_numbers = #tpu.dot_dimension_numbers<[1], [0], [0], [1], [0, 0, 1, 1], [], []>} : vector<8x8xbf16>, vector<8x8xbf16>, vector<8x8xf32> -> vector<8x8xf32>
    %102 = arith.truncf %101 : vector<8x8xf32> to vector<8x8xbf16>
    %c24 = arith.constant 24 : index
    %c0_42 = arith.constant 0 : index
    %103 = vector.load %arg3[%c24, %c0_42] : memref<32x32xbf16, #tpu.memory_space<vmem>>, vector<8x32xbf16>
    %cst_43 = arith.constant dense<0.000000e+00> : vector<8x32xf32>
    %104 = tpu.matmul %102, %103, %cst_43 {dimension_numbers = #tpu.dot_dimension_numbers<[1], [0], [0], [1], [0, 0, 1, 1], [], []>} : vector<8x8xbf16>, vector<8x32xbf16>, vector<8x32xf32> -> vector<8x32xf32>
    %105 = arith.addf %82, %104 : vector<8x32xf32>
    %106 = arith.addf %1, %105 : vector<8x32xf32>
    %c0_44 = arith.constant 0 : index
    %c0_45 = arith.constant 0 : index
    %107 = vector.load %arg6[%c0_44, %c0_45] : memref<1x32xf32, #tpu.memory_space<vmem>>, vector<1x32xf32>
    %c0_46 = arith.constant 0 : index
    %c0_47 = arith.constant 0 : index
    %108 = vector.load %arg7[%c0_46, %c0_47] : memref<1x32xf32, #tpu.memory_space<vmem>>, vector<1x32xf32>
    %cst_48 = arith.constant dense<0.000000e+00> : vector<8xf32>
    %109 = vector.multi_reduction <add>, %106, %cst_48 [1] : vector<8x32xf32> to vector<8xf32>
    %110 = vector.shape_cast %109 : vector<8xf32> to vector<8x1xf32>
    %111 = arith.mulf %106, %106 : vector<8x32xf32>
    %cst_49 = arith.constant dense<0.000000e+00> : vector<8xf32>
    %112 = vector.multi_reduction <add>, %111, %cst_49 [1] : vector<8x32xf32> to vector<8xf32>
    %113 = vector.shape_cast %112 : vector<8xf32> to vector<8x1xf32>
    %cst_50 = arith.constant 3.125000e-02 : f32
    %114 = vector.broadcast %cst_50 : f32 to vector<8x1xf32>
    %115 = arith.mulf %110, %114 : vector<8x1xf32>
    %cst_51 = arith.constant 3.125000e-02 : f32
    %116 = vector.broadcast %cst_51 : f32 to vector<8x1xf32>
    %117 = arith.mulf %113, %116 : vector<8x1xf32>
    %118 = arith.mulf %115, %115 : vector<8x1xf32>
    %119 = arith.subf %117, %118 : vector<8x1xf32>
    %120 = vector.broadcast %115 : vector<8x1xf32> to vector<8x32xf32>
    %121 = arith.subf %106, %120 : vector<8x32xf32>
    %cst_52 = arith.constant 9.99999974E-6 : f32
    %122 = vector.broadcast %cst_52 : f32 to vector<8x1xf32>
    %123 = arith.addf %119, %122 : vector<8x1xf32>
    %124 = math.rsqrt %123 : vector<8x1xf32>
    %125 = vector.broadcast %124 : vector<8x1xf32> to vector<8x32xf32>
    %126 = arith.mulf %121, %125 : vector<8x32xf32>
    %127 = vector.broadcast %107 : vector<1x32xf32> to vector<8x32xf32>
    %128 = arith.mulf %126, %127 : vector<8x32xf32>
    %129 = vector.broadcast %108 : vector<1x32xf32> to vector<8x32xf32>
    %130 = arith.addf %128, %129 : vector<8x32xf32>
    %131 = arith.truncf %130 : vector<8x32xf32> to vector<8x32xbf16>
    %c0_53 = arith.constant 0 : index
    %c0_54 = arith.constant 0 : index
    %132 = vector.load %arg4[%c0_53, %c0_54] : memref<32x128xbf16, #tpu.memory_space<vmem>>, vector<32x128xbf16>
    %cst_55 = arith.constant dense<0.000000e+00> : vector<8x128xf32>
    %133 = tpu.matmul %131, %132, %cst_55 {dimension_numbers = #tpu.dot_dimension_numbers<[1], [0], [0], [1], [0, 0, 1, 1], [], []>} : vector<8x32xbf16>, vector<32x128xbf16>, vector<8x128xf32> -> vector<8x128xf32>
    %cst_56 = arith.constant 0.000000e+00 : f32
    %134 = vector.broadcast %cst_56 : f32 to vector<8x128xf32>
    %135 = arith.maximumf %133, %134 : vector<8x128xf32>
    %136 = arith.truncf %135 : vector<8x128xf32> to vector<8x128xbf16>
    %c0_57 = arith.constant 0 : index
    %c0_58 = arith.constant 0 : index
    %137 = vector.load %arg5[%c0_57, %c0_58] : memref<128x32xbf16, #tpu.memory_space<vmem>>, vector<128x32xbf16>
    %cst_59 = arith.constant dense<0.000000e+00> : vector<8x32xf32>
    %138 = tpu.matmul %136, %137, %cst_59 {dimension_numbers = #tpu.dot_dimension_numbers<[1], [0], [0], [1], [0, 0, 1, 1], [], []>} : vector<8x128xbf16>, vector<128x32xbf16>, vector<8x32xf32> -> vector<8x32xf32>
    %139 = arith.addf %130, %138 : vector<8x32xf32>
    %c0_60 = arith.constant 0 : index
    %c0_61 = arith.constant 0 : index
    %140 = vector.load %arg8[%c0_60, %c0_61] : memref<1x32xf32, #tpu.memory_space<vmem>>, vector<1x32xf32>
    %c0_62 = arith.constant 0 : index
    %c0_63 = arith.constant 0 : index
    %141 = vector.load %arg9[%c0_62, %c0_63] : memref<1x32xf32, #tpu.memory_space<vmem>>, vector<1x32xf32>
    %cst_64 = arith.constant dense<0.000000e+00> : vector<8xf32>
    %142 = vector.multi_reduction <add>, %139, %cst_64 [1] : vector<8x32xf32> to vector<8xf32>
    %143 = vector.shape_cast %142 : vector<8xf32> to vector<8x1xf32>
    %144 = arith.mulf %139, %139 : vector<8x32xf32>
    %cst_65 = arith.constant dense<0.000000e+00> : vector<8xf32>
    %145 = vector.multi_reduction <add>, %144, %cst_65 [1] : vector<8x32xf32> to vector<8xf32>
    %146 = vector.shape_cast %145 : vector<8xf32> to vector<8x1xf32>
    %cst_66 = arith.constant 3.125000e-02 : f32
    %147 = vector.broadcast %cst_66 : f32 to vector<8x1xf32>
    %148 = arith.mulf %143, %147 : vector<8x1xf32>
    %cst_67 = arith.constant 3.125000e-02 : f32
    %149 = vector.broadcast %cst_67 : f32 to vector<8x1xf32>
    %150 = arith.mulf %146, %149 : vector<8x1xf32>
    %151 = arith.mulf %148, %148 : vector<8x1xf32>
    %152 = arith.subf %150, %151 : vector<8x1xf32>
    %153 = vector.broadcast %148 : vector<8x1xf32> to vector<8x32xf32>
    %154 = arith.subf %139, %153 : vector<8x32xf32>
    %cst_68 = arith.constant 9.99999974E-6 : f32
    %155 = vector.broadcast %cst_68 : f32 to vector<8x1xf32>
    %156 = arith.addf %152, %155 : vector<8x1xf32>
    %157 = math.rsqrt %156 : vector<8x1xf32>
    %158 = vector.broadcast %157 : vector<8x1xf32> to vector<8x32xf32>
    %159 = arith.mulf %154, %158 : vector<8x32xf32>
    %160 = vector.broadcast %140 : vector<1x32xf32> to vector<8x32xf32>
    %161 = arith.mulf %159, %160 : vector<8x32xf32>
    %162 = vector.broadcast %141 : vector<1x32xf32> to vector<8x32xf32>
    %163 = arith.addf %161, %162 : vector<8x32xf32>
    %c0_69 = arith.constant 0 : index
    %c0_70 = arith.constant 0 : index
    %c0_71 = arith.constant 0 : index
    %164 = vector.load %arg10[%c0_69, %c0_70, %c0_71] : memref<1x8x32xf32, #tpu.memory_space<vmem>>, vector<1x8x32xf32>
    %165 = vector.shape_cast %164 : vector<1x8x32xf32> to vector<8x32xf32>
    %166 = vector.shape_cast %163 : vector<8x32xf32> to vector<1x8x32xf32>
    tpu.vector_store %arg10[%c0_69, %c0_70, %c0_71], %166 {strides = array<i32>} : memref<1x8x32xf32, #tpu.memory_space<vmem>>, vector<1x8x32xf32>,
    return
  }
  func.func @transform_0(%arg0: i32) -> (i32, i32, i32) {
    %c0_i32 = arith.constant 0 : i32
    %c0_i32_0 = arith.constant 0 : i32
    %c0_i32_1 = arith.constant 0 : i32
    return %arg0, %c0_i32, %c0_i32_0 : i32, i32, i32
  }
  func.func @transform_1(%arg0: i32) -> (i32, i32) {
    %c0_i32 = arith.constant 0 : i32
    %c0_i32_0 = arith.constant 0 : i32
    %c0_i32_1 = arith.constant 0 : i32
    return %c0_i32, %c0_i32_0 : i32, i32
  }
  func.func @transform_2(%arg0: i32) -> (i32, i32) {
    %c0_i32 = arith.constant 0 : i32
    %c0_i32_0 = arith.constant 0 : i32
    %c0_i32_1 = arith.constant 0 : i32
    return %c0_i32, %c0_i32_0 : i32, i32
  }
  func.func @transform_3(%arg0: i32) -> (i32, i32) {
    %c0_i32 = arith.constant 0 : i32
    %c0_i32_0 = arith.constant 0 : i32
    %c0_i32_1 = arith.constant 0 : i32
    return %c0_i32, %c0_i32_0 : i32, i32
  }
  func.func @transform_4(%arg0: i32) -> (i32, i32) {
    %c0_i32 = arith.constant 0 : i32
    %c0_i32_0 = arith.constant 0 : i32
    %c0_i32_1 = arith.constant 0 : i32
    return %c0_i32, %c0_i32_0 : i32, i32
  }
  func.func @transform_5(%arg0: i32) -> (i32, i32) {
    %c0_i32 = arith.constant 0 : i32
    %c0_i32_0 = arith.constant 0 : i32
    %c0_i32_1 = arith.constant 0 : i32
    return %c0_i32, %c0_i32_0 : i32, i32
  }
  func.func @transform_6(%arg0: i32) -> (i32, i32) {
    %c0_i32 = arith.constant 0 : i32
    %c0_i32_0 = arith.constant 0 : i32
    %c0_i32_1 = arith.constant 0 : i32
    return %c0_i32, %c0_i32_0 : i32, i32
  }
  func.func @transform_7(%arg0: i32) -> (i32, i32) {
    %c0_i32 = arith.constant 0 : i32
    %c0_i32_0 = arith.constant 0 : i32
    %c0_i32_1 = arith.constant 0 : i32
    return %c0_i32, %c0_i32_0 : i32, i32
  }
  func.func @transform_8(%arg0: i32) -> (i32, i32) {
    %c0_i32 = arith.constant 0 : i32
    %c0_i32_0 = arith.constant 0 : i32
    %c0_i32_1 = arith.constant 0 : i32
    return %c0_i32, %c0_i32_0 : i32, i32
  }
  func.func @transform_9(%arg0: i32) -> (i32, i32, i32) {
    %c0_i32 = arith.constant 0 : i32
    %c0_i32_0 = arith.constant 0 : i32
    %c0_i32_1 = arith.constant 0 : i32
    return %arg0, %c0_i32, %c0_i32_0 : i32, i32, i32
  }
  func.func @transform_10(%arg0: i32) -> (i32, i32, i32, i32) {
    %c0_i32 = arith.constant 0 : i32
    %c0_i32_0 = arith.constant 0 : i32
    %c0_i32_1 = arith.constant 0 : i32
    %c0_i32_2 = arith.constant 0 : i32
    return %arg0, %c0_i32, %c0_i32_0, %c0_i32_1 : i32, i32, i32, i32
  }
}

</mosaic_0001>

<bundles_post_ra>
// kernel: tpu_custom_call.1
= control target key start
LH: loop header
LB: loop body
LE: loop exit
PB: predicated region body
PF: predicated region fallthrough
CT: control target
= control target key end

     0   :  { %s1612_s0 = inlined_call_operand.vmem [shape: f32[2,8,32], index: 0, kind: input, shape index: {}]   ;;  %s1613_s1 = inlined_call_operand.vmem [shape: bf16[32,96], index: 1, kind: input, shape index: {}]   ;;  %s1614_s2 = inlined_call_operand.vmem [shape: bf16[32,32], index: 2, kind: input, shape index: {}]   ;;  %s1615_s3 = inlined_call_operand.vmem [shape: bf16[32,128], index: 3, kind: input, shape index: {}]   ;;  %s1616_s4 = inlined_call_operand.vmem [shape: bf16[128,32], index: 4, kind: input, shape index: {}]   ;;  %s1617_s5 = inlined_call_operand.vmem [shape: f32[1,32], index: 5, kind: input, shape index: {}]   ;;  %s1618_s6 = inlined_call_operand.vmem [shape: f32[1,32], index: 6, kind: input, shape index: {}]   ;;  %s1619_s7 = inlined_call_operand.vmem [shape: f32[1,32], index: 7, kind: input, shape index: {}]   ;;  %s1620_s8 = inlined_call_operand.vmem [shape: f32[1,32], index: 8, kind: input, shape index: {}]   ;;  %s1621_s9 = inlined_call_operand.hbm [shape: f32[2,8,32], index: 9, kind: output, shape index: {0}]   ;;  %s1622_s10 = inlined_call_operand.hbm [shape: f32[2,4,8,8], index: 10, kind: output, shape index: {1}]  }
   0x1   :  { %1623 = sst [smem:[#allocation8_spill]] %s1612_s0 }
   0x2   :  { %1624 = sst [smem:[#allocation9_spill]] %s1613_s1 }
   0x3   :  { %1625 = sst [smem:[#allocation10_spill]] %s1614_s2 }
   0x4   :  { %1626 = sst [smem:[#allocation11_spill]] %s1615_s3 }
   0x5   :  { %1627 = sst [smem:[#allocation12_spill]] %s1616_s4 }
   0x6   :  { %16 = vsyncpa [#allocation3], 0 }
   0x7   :  { %18 = vsyncpa [#allocation3 + $0x1], 0 }
   0x8   :  { %19 = vsyncpa [#allocation5], 0 }
   0x9   :  { %21 = vsyncpa [#allocation5 + $0x1], 0  ;;  %s1378_s13 = smov 0   ;;  %s1380_s14 = smov 0  }
   0xa   :  { %s1382_s15 = smov 0   ;;  %s1384_s16 = smov 0  }
   0xb LB: > { %s1399_s17 = sadd.s32 4294967295, %s1308_s16   ;;  %s1041_s18 = sadd.s32 4294967294, %s1308_s16   ;;  %s1308_s16 = sphi %s1384_s16, %s1638_s16   ;;  %s1304_s15 = sphi %s1382_s15, %s1637_s15   ;;  %s1300_s14 = sphi %s1380_s14, %s1636_s14   ;;  %s1296_s13 = sphi %s1378_s13, %s1635_s13  }
   0xc   : > { %s1403_s19 = sadd.s32 1, %s1308_s16   ;;  %s228_s20 = sadd.s32 1, %s1304_s15 }
   0xd   : > { %s225_s21 = ssub.s32 %s1308_s16, %s1403_s19  ;;  %p238_p0 = scmp.ne.s32.totalorder %s1304_s15, %s1300_s14 }
   0xe   : > { %p226_p1 = scmp.eq.s32.totalorder %s225_s21, 0  ;;  %p239_p2 = scmp.eq.s32.totalorder %s1399_s17, 1 }
   0xf   : > { %p244_p3 = scmp.ne.s32.totalorder %s1300_s14, %s1296_s13  ;;  %p245_p4 = scmp.eq.s32.totalorder %s1041_s18, 1 }
  0x10   : > { %s1414_s22 = scalar_select %p226_p1, %s1304_s15, %s228_s20  }
  0x11   : > { %p1416_p5 = por %p239_p2, %p238_p0  ;;  %p1420_p6 = por %p245_p4, %p244_p3 }
  0x12   : > { %p1044_p7 = scmp.ge.s32.totalorder %s1308_s16, 1  ;;  %p320_p8 = scmp.lt.s32.totalorder %s1308_s16, 3 }
  0x14   : > { %p321_p9 = pnand %p1044_p7, %p320_p8 }
  0x15   : > { %s1630_s1 = sld [smem:[#allocation9_spill]] (!%p321_p9)  ;;  %p362_p10 = scmp.lt.s32.totalorder (!%p321_p9), %s1399_s17, 1 }
  0x16   : > { %324 = sbr.rel (%p321_p9) target bundleno = 2064 (0x810), region = 56  ;;  %s1631_s0 = sld [smem:[#allocation8_spill]] (!%p321_p9) }
  0x17   : > { %s1310_s20 = smov (!%p321_p9), 88   ;;  %s1311_s21 = smov (!%p321_p9), 96  }
  0x18   : > { %s1312_s25 = smov (!%p321_p9), 120   ;;  %s1313_s26 = smov (!%p321_p9), 80  }
  0x19   : > { %s1314_s27 = smov (!%p321_p9), 72   ;;  %s1315_s28 = smov (!%p321_p9), 112  }
  0x1a   : > { %s1632_s2 = sld [smem:[#allocation10_spill]] (!%p321_p9)  ;;  %s1316_s11 = smov (!%p321_p9), 64  }
  0x1b   : > { %v1121_v0 = vld [vmem:[%s1630_s1 + $0x8] sm:$0xff]  ;;  %v1120_v1 = vld [vmem:[%s1630_s1] sm:$0xff]  ;;  %s363_s29 = scalar_select %p362_p10, %s1399_s17, 1  ;;  %vm385_vm0 = vcmask 261120   ;;  %vm448_vm1 = vcmask 1043456   ;;  %vm410_vm2 = vcmask 64512  }
  0x1c   : > { %395 = vmatpush.bf16.msra.mxu0 %v1121_v0  ;;  %s1317_s12 = smov 104   ;;  %s1633_s3 = sld [smem:[#allocation11_spill]] }
  0x1d   : > { %s1047_s30 = sshll.u32 %s363_s29, 3  ;;  %s1320_s29 = smov 48  }
  0x1e   : > { %s365_s18 = scalar_lea.vmem %s1631_s0, %s1047_s30  ;;  %s1634_s4 = sld [smem:[#allocation12_spill]] }
  0x1f   : > { %v1437_v2 = vld [vmem:[%s365_s18] sm:$0xff]  ;;  %s1318_s18 = smov 56  }
  0x20   : > { %396 = vmatpush.bf16.msra.mxu0 %v1120_v1  ;;  %v368_v3 = vpack.c.bf16 %v1437_v2, %v1437_v2  ;;  %v466_v13 = vld [vmem:[%s1632_s2] sm:$0xf]  ;;  %v529_v59 = vld [vmem:[%s1632_s2 + $0x4] sm:$0xf] }
  0x21   : > { %v553_v14 = vsel %vm448_vm1, %v466_v13, 0  ;;  %v534_v60 = vsel %vm448_vm1, %v529_v59, 0 }
  0x22   : > { %562 = vmatpush.bf16.msra.mxu1 %v553_v14 }
  0x23   : > { %1056 = vmatmul.msk.bf16.vlgmr.msra.gmra.mxu0 %vm385_vm0, %v368_v3 }
  0x24   : > { %543 = vmatpush.bf16.msrb.mxu0 %v534_v60  ;;  %v1130_v60 = vld [vmem:[%s1634_s4 + $0x30] sm:$0xff] }
  0xa0   : > { %v398_v4 = vpop.f32.mrf.mxu0 }
  0xa1   : > { %v402_v5 = vmul.f32 0.35355338, %v398_v4  ;;  %v404_v6 = vpack.c.bf16 %v398_v4, %v398_v4 }
  0xa3   : > { %v406_v7 = vunpack.c.l.b16 %v404_v6  ;;  %v403_v8 = vpack.c.bf16 %v402_v5, %v402_v5 }
  0xa5   : > { %v1442_v9 = vpack.c.b16 %v406_v7, %v406_v7  ;;  %v468_v11 = vunpack.c.l.b16 %v403_v8 }
  0xa7   : > { %472 = vrot.lane.b32.xlu2 %v1442_v9, %s1310_s20  ;;  %408 = vrot.lane.b32.xlu0 %v1442_v9, %s1311_s21  ;;  %v469_v12 = vpack.c.b16 %v468_v11, %v468_v11  ;;  %s1319_s20 = smov 40   ;;  %s1471_s21 = sand.u32 1, %s1300_s14  }
  0xa8   : > { %v400_v10 = vpop.f32.mrf.mxu0 }
  0xaf   : > { %470 = vrot.lane.b32.xlu2 %v469_v12, %s1312_s25  ;;  %s1046_s25 = sshll.u32 %s1471_s21, 5 }
  0xb7   : > { %570 = vrot.lane.b32.xlu2 %v1442_v9, %s1313_s26  ;;  %s1474_s26 = scalar_lea.vmem [#allocation4], %s1046_s25 }
  0xb8   : > { %s943_s25 = sshll.u32 %s1474_s26, 4  ;;  %s944_s25 = int_to_ptr.vmem [resolvable:$true] %s943_s25 }
  0xbf   : > { %650 = vrot.lane.b32.xlu2 %v1442_v9, %s1314_s27 }
  0xc7   : > { %568 = vrot.lane.b32.xlu2 %v469_v12, %s1315_s28  ;;  %s917_s28 = scalar_lea.sflag [#allocation5], %s1471_s21 }
 0x101   : > { %v473_v15 = vpop.permute.xlu2 %472 }
 0x102   : > { %v478_v22 = vsel %vm410_vm2, %v473_v15, 0 }
 0x109   : > { %v471_v16 = vpop.permute.xlu2 %470 }
 0x111   : > { %v571_v17 = vpop.permute.xlu2 %570 }
 0x112   : > { %v576_v23 = vsel %vm410_vm2, %v571_v17, 0 }
 0x119   : > { %v409_v18 = vpop.permute.xlu0 %408  ;;  %v651_v19 = vpop.permute.xlu2 %650 }
 0x11a   : > { %v415_v20 = vsel %vm410_vm2, %v409_v18, 0  ;;  %v656_v21 = vsel %vm410_vm2, %v651_v19, 0 }
 0x11b   : > { %424 = vmatpush.bf16.xpose.msra.mxu3 %v415_v20  ;;  %665 = vmatpush.bf16.xpose.msrb.mxu1 %v656_v21 }
 0x121   : > { %v569_v24 = vpop.permute.xlu2 %568 }
 0x122   : > { %1057 = vmatmul.msk.bf16.vlgmr.msra.gmra.mxu3 %vm410_vm2, %v403_v8 }
 0x123   : > { %487 = vmatpush.bf16.xpose.msrb.mxu3 %v478_v22 }
 0x12b   : > { %585 = vmatpush.bf16.xpose.msra.mxu3 %v576_v23 }
 0x132   : > { %1059 = vmatmul.msk.bf16.vlgmr.msrb.gmra.mxu3 %vm410_vm2, %v471_v16 }
 0x142   : > { %1064 = vmatmul.msk.bf16.vlgmr.msra.gmra.mxu3 %vm410_vm2, %v569_v24 }
 0x1a5   : > { %v426_v25 = vpop.f32.mrf.mxu3 }
 0x1a6   : > { %v430_v26 = vsel %vm410_vm2, %v426_v25, -inf }
 0x1a7   : > { %431 = vmax.xlane.f32.xlu0 %v430_v26 }
 0x1ad   : > { %v428_v27 = vpop.f32.mrf.mxu3 }
 0x1ae   : > { %v707_v27 = vld [vmem:[%s1632_s2 + $0xc] sm:$0xf] }
 0x1b5   : > { %v489_v28 = vpop.f32.mrf.mxu3 }
 0x1b6   : > { %v493_v29 = vsel %vm410_vm2, %v489_v28, -inf }
 0x1b7   : > { %494 = vmax.xlane.f32.xlu2 %v493_v29 }
 0x1bd   : > { %v491_v30 = vpop.f32.mrf.mxu3 }
 0x1c5   : > { %v1461_v31 = vpop.f32.mrf.mxu3 }
 0x1c6   : > { %v591_v32 = vsel %vm410_vm2, %v1461_v31, -inf }
 0x1c7   : > { %592 = vmax.xlane.f32.xlu0 %v591_v32 }
 0x1cd   : > { %v589_v33 = vpop.f32.mrf.mxu3 }
 0x21a   : > { %v432_v34 = vpop.xlane.xlu0 %431 }
 0x21b   : > { %v433_v35 = vsub.f32 %v426_v25, %v432_v34 }
 0x21d   : > { %v434_v36 = vmul.f32 1.442695, %v433_v35 }
 0x21f   : > { %1194 = vpow2.f32 %v434_v36 }
 0x225   : > { %v1195_v37 = vpop.eup %1194 }
 0x226   : > { %v436_v38 = vsel %vm410_vm2, %v1195_v37, 0.0 }
 0x227   : > { %437 = vadd.xlane.f32.xlu1 %v436_v38 }
 0x22a   : > { %v495_v39 = vpop.xlane.xlu2 %494 }
 0x22b   : > { %v496_v40 = vsub.f32 %v489_v28, %v495_v39 }
 0x22d   : > { %v497_v41 = vmul.f32 1.442695, %v496_v40 }
 0x22f   : > { %1196 = vpow2.f32 %v497_v41 }
 0x235   : > { %v1197_v42 = vpop.eup %1196 }
 0x236   : > { %v499_v43 = vsel %vm410_vm2, %v1197_v42, 0.0 }
 0x237   : > { %500 = vadd.xlane.f32.xlu0 %v499_v43 }
 0x23a   : > { %v593_v46 = vpop.xlane.xlu0 %592 }
 0x23b   : > { %v594_v6 = vsub.f32 %v1461_v31, %v593_v46  ;;  %v712_v31 = vsel %vm448_vm1, %v707_v27, 0 }
 0x23d   : > { %v595_v8 = vmul.f32 1.442695, %v594_v6  ;;  %v1126_v6 = vld [vmem:[%s1634_s4 + $0x10] sm:$0xff] }
 0x240   : > { %443 = vrot.lane.b32.xlu1 %v1442_v9, %s1316_s11  ;;  %s1132_s11 = sshll.u32 %s1399_s17, 5 }
 0x248   : > { %648 = vrot.lane.b32.xlu1 %v469_v12, %s1317_s12 }
 0x24b   : > { %507 = vrot.lane.b32.xlu0 %v1442_v9, %s1318_s18 }
 0x253   : > { %685 = vrot.lane.b32.xlu0 %v1442_v9, %s1319_s20  ;;  %s942_s20 = scalar_lea.hbm %s1622_s10, %s1132_s11 }
 0x254   : > { %s945_s27 = sshll.u32 %s942_s20, 4  ;;  %s946_s27 = int_to_ptr.hbm [resolvable:$true] %s945_s27 }
 0x29a   : > { %v438_v44 = vpop.xlane.xlu1 %437 }
 0x29b   : > { %1198 = vrcp.f32 %v438_v44 }
 0x2a1   : > { %v1199_v45 = vpop.eup %1198 }
 0x2a2   : > { %v440_v47 = vmul.f32 %v1199_v45, %v1195_v37 }
 0x2a4   : > { %441 = vst.msk [vmem:[%s1474_s26] sm:$0xff] %vm410_vm2, %v440_v47  ;;  %v442_v53 = vpack.c.bf16 %v440_v47, %v440_v47 }
 0x2aa   : > { %v501_v48 = vpop.xlane.xlu0 %500 }
 0x2ab   : > { %1200 = vrcp.f32 %v501_v48 }
 0x2ac   : > { %1202 = vpow2.f32 %v595_v8 }
 0x2b1   : > { %v1201_v49 = vpop.eup %1200 }
 0x2b2   : > { %v503_v50 = vmul.f32 %v1201_v49, %v1197_v42  ;;  %v444_v51 = vpop.permute.xlu1 %443  ;;  %v1203_v14 = vpop.eup %1202 }
 0x2b3   : > { %v450_v52 = vsel %vm448_vm1, %v444_v51, 0  ;;  %v597_v17 = vsel %vm410_vm2, %v1203_v14, 0.0 }
 0x2b4   : > { %459 = vmatpush.bf16.msra.mxu2 %v450_v52  ;;  %1060 = vst.msk [vmem:[%s1474_s26 + $0x8] sm:$0xff] %vm410_vm2, %v503_v50  ;;  %v506_v57 = vpack.c.bf16 %v503_v50, %v503_v50  ;;  %v1123_v52 = vld [vmem:[%s1633_s3 + $0x8] sm:$0xff] }
 0x2b7   : > { %1058 = vmatmul.msk.bf16.vlgmr.msra.gmra.mxu2 %vm410_vm2, %v442_v53  ;;  %v1122_v53 = vld [vmem:[%s1633_s3] sm:$0xff] }
 0x2ba   : > { %v649_v3 = vpop.permute.xlu1 %648 }
 0x2bd   : > { %v508_v54 = vpop.permute.xlu0 %507 }
 0x2be   : > { %v513_v55 = vsel %vm448_vm1, %v508_v54, 0 }
 0x2bf   : > { %522 = vmatpush.bf16.msrb.mxu2 %v513_v55 }
 0x2c5   : > { %v686_v56 = vpop.permute.xlu0 %685 }
 0x2c6   : > { %v691_v58 = vsel %vm448_vm1, %v686_v56, 0 }
 0x2c7   : > { %1061 = vmatmul.msk.bf16.vlgmr.msrb.gmra.mxu2 %vm410_vm2, %v506_v57  ;;  %700 = vmatpush.bf16.msrb.mxu3 %v691_v58  ;;  %v1131_v58 = vld [vmem:[%s1634_s4 + $0x38] sm:$0xff] }
 0x33a   : > { %v461_v61 = vpop.f32.mrf.mxu2 }
 0x33b   : > { %v465_v62 = vpack.c.bf16 %v461_v61, %v461_v61 }
 0x33d   : > { %1063 = vmatmul.msk.bf16.vlgmr.msra.gmra.mxu1 %vm410_vm2, %v465_v62  ;;  %v1129_v62 = vld [vmem:[%s1634_s4 + $0x28] sm:$0xff] }
 0x33e   : > { %862 = vmatpush.bf16.msra.mxu1 %v1131_v58 }
 0x342   : > { %v463_v63 = vpop.f32.mrf.mxu2  ;;  %863 = vmatpush.bf16.msra.mxu1 %v1130_v60 }
 0x343   : > { %v1128_v63 = vld [vmem:[%s1634_s4 + $0x20] sm:$0xff] }
 0x346   : > { %864 = vmatpush.bf16.msra.mxu1 %v1129_v62 }
 0x34a   : > { %v524_v0 = vpop.f32.mrf.mxu2  ;;  %865 = vmatpush.bf16.msra.mxu1 %v1128_v63 }
 0x34b   : > { %v528_v1 = vpack.c.bf16 %v524_v0, %v524_v0 }
 0x34d   : > { %1062 = vmatmul.msk.bf16.vlgmr.msrb.gmra.mxu0 %vm410_vm2, %v528_v1  ;;  %1068 = vmatmul.msk.bf16.vlgmr.msrb.gmra.mxu1 %vm410_vm2, %v649_v3  ;;  %v1127_v3 = vld [vmem:[%s1634_s4 + $0x18] sm:$0xff] }
 0x34e   : > { %866 = vmatpush.bf16.msra.mxu1 %v1127_v3 }
 0x352   : > { %v526_v4 = vpop.f32.mrf.mxu2  ;;  %867 = vmatpush.bf16.msra.mxu1 %v1126_v6 }
 0x3ba   : > { %v564_v5 = vpop.f32.mrf.mxu1 }
 0x3c2   : > { %v566_v7 = vpop.f32.mrf.mxu1 }
 0x3ca   : > { %v545_v10 = vpop.f32.mrf.mxu0  ;;  %v667_v11 = vpop.f32.mrf.mxu1 }
 0x3cb   : > { %v565_v12 = vadd.f32 %v564_v5, %v545_v10  ;;  %v671_v13 = vsel %vm410_vm2, %v667_v11, -inf }
 0x3cc   : > { %672 = vmax.xlane.f32.xlu1 %v671_v13 }
 0x3d2   : > { %v547_v15 = vpop.f32.mrf.mxu0  ;;  %v669_v16 = vpop.f32.mrf.mxu1 }
 0x3d3   : > { %v1191_v15 = vld [vmem:[%s1618_s6] ss:$0 sm:$0xff] }
 0x3d4   : > { %598 = vadd.xlane.f32.xlu1 %v597_v17 }
 0x43f   : > { %v673_v18 = vpop.xlane.xlu1 %672 }
 0x440   : > { %v674_v19 = vsub.f32 %v667_v11, %v673_v18  ;;  %v1190_v11 = vld [vmem:[%s1617_s5] ss:$0 sm:$0xff] }
 0x442   : > { %v675_v20 = vmul.f32 1.442695, %v674_v19  ;;  %v1124_v19 = vld [vmem:[%s1634_s4] sm:$0xff] }
 0x444   : > { %1204 = vpow2.f32 %v675_v20 }
 0x447   : > { %v599_v21 = vpop.xlane.xlu1 %598 }
 0x448   : > { %1206 = vrcp.f32 %v599_v21 }
 0x44a   : > { %v1205_v22 = vpop.eup %1204 }
 0x44b   : > { %v677_v23 = vsel %vm410_vm2, %v1205_v22, 0.0 }
 0x44c   : > { %678 = vadd.xlane.f32.xlu2 %v677_v23 }
 0x44e   : > { %v1207_v24 = vpop.eup %1206 }
 0x44f   : > { %v601_v25 = vmul.f32 %v1207_v24, %v1203_v14 }
 0x451   : > { %1065 = vst.msk [vmem:[%s1474_s26 + $0x10] sm:$0xff] %vm410_vm2, %v601_v25  ;;  %v604_v34 = vpack.c.bf16 %v601_v25, %v601_v25 }
 0x464   : > { %605 = vrot.lane.b32.xlu2 %v1442_v9, %s1320_s29  ;;  %v627_v9 = vld [vmem:[%s1632_s2 + $0x8] sm:$0xf]  ;;  %s1228_s29 = sshra.s32 %s946_s27, 4  ;;  %s1234_s2 = scalar_lea.hbm %s1622_s10, 64  ;;  %s1229_s29 = int_to_ptr.hbm [resolvable:$true] %s1228_s29 }
 0x465   : > { %v632_v35 = vsel %vm448_vm1, %v627_v9, 0  ;;  %s1230_s30 = scalar_lea.hbm %s1229_s29, 32  ;;  %p1235_p0 = scmp.lt.s32.totalorder %s1229_s29, %s1622_s10 }
 0x466   : > { %641 = vmatpush.bf16.msra.mxu0 %v632_v35  ;;  %p1231_p11 = scmp.ne.s32.totalorder %s1229_s29, %s1230_s30  ;;  %p1236_p1 = scmp.lt.s32.totalorder %s1234_s2, %s1230_s30 }
 0x468   : > { %p1232_p12 = pnand %p1231_p11, %p1416_p5  ;;  %p1237_p2 = por %p1236_p1, %p1235_p0 }
 0x46a   : > { %789 = vmatpush.bf16.msrb.mxu0 %v1123_v52  ;;  %p1233_p13 = pneg %p1232_p12 }
 0x46c   : > { %p1238_p3 = pnand %p1237_p2, %p1233_p13 }
 0x46e   : > { %790 = vmatpush.bf16.msrb.mxu0 %v1122_v53 }
 0x4bf   : > { %v679_v26 = vpop.xlane.xlu2 %678 }
 0x4c0   : > { %1208 = vrcp.f32 %v679_v26 }
 0x4c6   : > { %v1209_v28 = vpop.eup %1208 }
 0x4c7   : > { %v681_v29 = vmul.f32 %v1209_v28, %v1205_v22  ;;  %v606_v30 = vpop.permute.xlu2 %605 }
 0x4c8   : > { %v611_v32 = vsel %vm448_vm1, %v606_v30, 0 }
 0x4c9   : > { %v684_v33 = vpack.c.bf16 %v681_v29, %v681_v29  ;;  %620 = vmatpush.bf16.msra.mxu2 %v611_v32  ;;  %1069 = vst.msk [vmem:[%s1474_s26 + $0x18] sm:$0xff] %vm410_vm2, %v681_v29 }
 0x4cb   : > { %1070 = vmatmul.msk.bf16.vlgmr.msrb.gmra.mxu3 %vm410_vm2, %v684_v33 }
 0x4cc   : > { %1066 = vmatmul.msk.bf16.vlgmr.msra.gmra.mxu2 %vm410_vm2, %v604_v34 }
 0x4cd   : > { %721 = vmatpush.bf16.msrb.mxu2 %v712_v31 }
 0x54e   : > { %v702_v36 = vpop.f32.mrf.mxu3 }
 0x54f   : > { %v706_v37 = vpack.c.bf16 %v702_v36, %v702_v36  ;;  %v622_v38 = vpop.f32.mrf.mxu2 }
 0x550   : > { %v626_v39 = vpack.c.bf16 %v622_v38, %v622_v38 }
 0x551   : > { %1071 = vmatmul.msk.bf16.vlgmr.msrb.gmra.mxu2 %vm410_vm2, %v706_v37 }
 0x552   : > { %1067 = vmatmul.msk.bf16.vlgmr.msra.gmra.mxu0 %vm410_vm2, %v626_v39 }
 0x556   : > { %v704_v40 = vpop.f32.mrf.mxu3 }
 0x557   : > { %v624_v41 = vpop.f32.mrf.mxu2 }
 0x5cf   : > { %v643_v42 = vpop.f32.mrf.mxu0 }
 0x5d0   : > { %v647_v43 = vadd.f32 %v643_v42, %v565_v12  ;;  %v1125_v12 = vld [vmem:[%s1634_s4 + $0x8] sm:$0xff] }
 0x5d1   : > { %868 = vmatpush.bf16.msra.mxu1 %v1125_v12 }
 0x5d4   : > { %v723_v44 = vpop.f32.mrf.mxu2 }
 0x5d5   : > { %v727_v45 = vadd.f32 %v723_v44, %v647_v43  ;;  %869 = vmatpush.bf16.msra.mxu1 %v1124_v19 }
 0x5d7   : > { %v728_v46 = vadd.f32 %v727_v45, %v1437_v2  ;;  %v645_v47 = vpop.f32.mrf.mxu0 }
 0x5d9   : > { %v731_v48 = vsel %vm385_vm0, %v728_v46, 0.0  ;;  %v734_v49 = vmul.f32 %v728_v46, %v728_v46 }
 0x5da   : > { %732 = vadd.xlane.f32.xlu1 %v731_v48 }
 0x5db   : > { %v735_v50 = vsel %vm385_vm0, %v734_v49, 0.0 }
 0x5dc   : > { %v725_v51 = vpop.f32.mrf.mxu2  ;;  %736 = vadd.xlane.f32.xlu0 %v735_v50 }
 0x64d   : > { %v733_v54 = vpop.xlane.xlu1 %732 }
 0x64e   : > { %v738_v2 = vmul.f32 0.03125, %v733_v54 }
 0x64f   : > { %v737_v55 = vpop.xlane.xlu0 %736 }
 0x650   : > { %v740_v56 = vmul.f32 %v738_v2, %v738_v2  ;;  %v739_v57 = vmul.f32 0.03125, %v737_v55  ;;  %v742_v10 = vsub.f32 %v728_v46, %v738_v2 }
 0x652   : > { %v741_v59 = vsub.f32 %v739_v57, %v740_v56 }
 0x654   : > { %v743_v61 = vadd.f32 1e-05, %v741_v59 }
 0x656   : > { %1210 = vrsqrt.f32 %v743_v61  ;;  %vm750_vm4 = vweird.f32 %v743_v61 }
 0x65c   : > { %v1211_v0 = vpop.eup %1210 }
 0x65d   : > { %v745_v1 = vmul.f32 %v1211_v0, %v743_v61  ;;  %vm751_vm3 = vweird.f32 %v1211_v0 }
 0x65e   : > { %vm752_vm5 = vmor %vm750_vm4, %vm751_vm3 }
 0x65f   : > { %v746_v4 = vmul.f32 %v1211_v0, %v745_v1 }
 0x661   : > { %v747_v5 = vmul.f32 0.5, %v746_v4 }
 0x663   : > { %v748_v7 = vsub.f32 1.5, %v747_v5 }
 0x665   : > { %v749_v8 = vmul.f32 %v1211_v0, %v748_v7 }
 0x667   : > { %v753_v13 = vsel %vm752_vm5, %v1211_v0, %v749_v8 }
 0x668   : > { %v754_v14 = vmul.f32 %v753_v13, %v742_v10 }
 0x66a   : > { %v758_v16 = vmul.f32 %v1190_v11, %v754_v14 }
 0x66c   : > { %v762_v17 = vadd.f32 %v1191_v15, %v758_v16 }
 0x66e   : > { %v763_v18 = vpack.c.bf16 %v762_v17, %v762_v17 }
 0x670   : > { %1080 = vmatmul.msk.bf16.vlgmr.msrb.gmra.mxu0 %vm385_vm0, %v763_v18 }
 0x6ed   : > { %v792_v20 = vpop.f32.mrf.mxu0 }
 0x6ee   : > { %v796_v21 = vmax.f32 %v792_v20, 0.0 }
 0x6f0   : > { %v797_v22 = vpack.c.bf16 %v796_v21, %v796_v21 }
 0x6f2   : > { %870 = vmatmul.bf16.vlgmr.msra.gmra.mxu1 %v797_v22 }
 0x6f5   : > { %v794_v23 = vpop.f32.mrf.mxu0 }
 0x76f   : > { %v871_v24 = vpop.f32.mrf.mxu1 }
 0x770   : > { %v875_v25 = vadd.f32 %v871_v24, %v762_v17 }
 0x772   : > { %v878_v26 = vsel %vm385_vm0, %v875_v25, 0.0  ;;  %v881_v27 = vmul.f32 %v875_v25, %v875_v25 }
 0x773   : > { %879 = vadd.xlane.f32.xlu1 %v878_v26 }
 0x774   : > { %v882_v29 = vsel %vm385_vm0, %v881_v27, 0.0 }
 0x777   : > { %v873_v28 = vpop.f32.mrf.mxu1 }
 0x77b   : > { %883 = vadd.xlane.f32.xlu1 %v882_v29 }
 0x77c   : > { %1241 = shalt.err (!%p1238_p3)
}
 0x77d   : > { %s1321_s26 = smov 128   ;;  %s1322_s11 = smov 8   ;;  %v1192_v43 = vld [vmem:[%s1619_s7] ss:$0 sm:$0xff] }
 0x77e   : > { %1134 = dma.vmem_to_hbm [thread:$0]  (%p1416_p5), %s944_s25, 512, %s946_s27, %s917_s28, %s1321_s26, %s1321_s26, %s1322_s11  }
 0x77f   : > { %s1045_s0 = sshll.u32 %s1471_s21, 3  ;;  %s1115_s1 = sshll.u32 %s1399_s17, 3  ;;  %v1193_v46 = vld [vmem:[%s1620_s8] ss:$0 sm:$0xff] }
 0x780   : > { %s927_s18 = scalar_lea.hbm %s1621_s9, %s1115_s1  ;;  %s354_s17 = scalar_lea.vmem [#allocation2], %s1045_s0 }
 0x781   : > { %s929_s27 = sshll.u32 %s354_s17, 4  ;;  %s931_s28 = sshll.u32 %s927_s18, 4  ;;  %s930_s27 = int_to_ptr.vmem [resolvable:$true] %s929_s27  ;;  %s932_s28 = int_to_ptr.hbm [resolvable:$true] %s931_s28 }
 0x782   : > { %s912_s29 = scalar_lea.sflag [#allocation3], %s1471_s21  ;;  %s1256_s30 = sshra.s32 %s932_s28, 4  ;;  %s1257_s30 = int_to_ptr.hbm [resolvable:$true] %s1256_s30 }
 0x783   : > { %s1258_s26 = scalar_lea.hbm %s1257_s30, 8  ;;  %s1262_s0 = scalar_lea.hbm %s1621_s9, 16 }
 0x784   : > { %p1259_p4 = scmp.ne.s32.totalorder %s1257_s30, %s1258_s26  ;;  %p1263_p9 = scmp.lt.s32.totalorder %s1257_s30, %s1621_s9 }
 0x785   : > { %p1264_p10 = scmp.lt.s32.totalorder %s1262_s0, %s1258_s26 }
 0x786   : > { %p1260_p7 = pnand %p1259_p4, %p1416_p5 }
 0x787   : > { %p1265_p11 = por %p1264_p10, %p1263_p9 }
 0x788   : > { %p1261_p8 = pneg %p1260_p7 }
 0x78a   : > { %p1266_p12 = pnand %p1265_p11, %p1261_p8 }
 0x7e6   : > { %v880_v30 = vpop.xlane.xlu1 %879 }
 0x7e7   : > { %v885_v31 = vmul.f32 0.03125, %v880_v30 }
 0x7e9   : > { %v887_v33 = vmul.f32 %v885_v31, %v885_v31  ;;  %v889_v42 = vsub.f32 %v875_v25, %v885_v31 }
 0x7ee   : > { %v884_v32 = vpop.xlane.xlu1 %883 }
 0x7ef   : > { %v886_v34 = vmul.f32 0.03125, %v884_v32 }
 0x7f1   : > { %v888_v9 = vsub.f32 %v886_v34, %v887_v33 }
 0x7f3   : > { %v890_v35 = vadd.f32 1e-05, %v888_v9 }
 0x7f5   : > { %1212 = vrsqrt.f32 %v890_v35  ;;  %vm897_vm7 = vweird.f32 %v890_v35 }
 0x7fb   : > { %v1213_v36 = vpop.eup %1212 }
 0x7fc   : > { %v892_v37 = vmul.f32 %v1213_v36, %v890_v35  ;;  %vm898_vm6 = vweird.f32 %v1213_v36 }
 0x7fd   : > { %vm899_vm8 = vmor %vm897_vm7, %vm898_vm6 }
 0x7fe   : > { %v893_v38 = vmul.f32 %v1213_v36, %v892_v37 }
 0x800   : > { %v894_v39 = vmul.f32 0.5, %v893_v38 }
 0x802   : > { %v895_v40 = vsub.f32 1.5, %v894_v39 }
 0x804   : > { %v896_v41 = vmul.f32 %v1213_v36, %v895_v40 }
 0x806   : > { %v900_v44 = vsel %vm899_vm8, %v1213_v36, %v896_v41 }
 0x807   : > { %v901_v45 = vmul.f32 %v900_v44, %v889_v42 }
 0x809   : > { %v905_v47 = vmul.f32 %v1192_v43, %v901_v45 }
 0x80b   : > { %v909_v48 = vadd.f32 %v1193_v46, %v905_v47 }
 0x80d   : > { %910 = vst.msk [vmem:[%s354_s17] sm:$0xff] %vm385_vm0, %v909_v48 }
 0x80e   : > { %1269 = shalt.err (!%p1266_p12)
}
 0x80f   : > { %1133 = dma.vmem_to_hbm [thread:$0]  (%p1416_p5), %s930_s27, 128, %s932_s28, %s912_s29  }
 0x810 PF: > { %p1144_p13 = scmp.ge.s32.totalorder %s1308_s16, 2  ;;  %s960_s21 = sand.u32 1, %s1296_s13  }
 0x811   : > { %s961_s4 = scalar_lea.sflag [#allocation3], %s960_s21 }
 0x812   : > { %p1138_p0 = pnand %p1144_p13, %p1420_p6 }
 0x814   : > { %p1139_p1 = pneg %p1138_p0 }
 0x816   : > { %1287 = dma.done.wait (%p1139_p1), %s961_s4, 128  }
 0x817   : > { %1289 = vsyncadd (%p1139_p1), %s961_s4, 4294967168  ;;  %s971_s12 = scalar_lea.sflag [#allocation5], %s960_s21 }
 0x818   : > { %1291 = dma.done.wait (%p1139_p1), %s971_s12, 512  }
 0x819   : > { %1293 = vsyncadd (%p1139_p1), %s971_s12, 4294966784  ;;  %p24_p5 = scmp.ge.s32.totalorder %s1403_s19, 4   ;;  %s1635_s13 = smov %s1300_s14 }
 0x81a   : > { %s1636_s14 = smov %s1304_s15  ;;  %s1637_s15 = smov %s1414_s22 }
 0x81b   : > { %s1638_s16 = smov %s1403_s19  ;;  %26 = sbr.rel (!%p24_p5) target bundleno = 11 (0xb), region = 111 }
 0x820   :  { %977 = vsyncpa [#allocation3], 1 }
 0x821   :  { %979 = vsyncpa [#allocation3 + $0x1], 1 }
 0x822   :  { %980 = vsyncpa [#allocation5], 1 }
 0x823   :  { %982 = vsyncpa [#allocation5 + $0x1], 1 }

</bundles_post_ra>
